<compile_context>
chip_gen: v6e
topology: v6e:2x2x1
jax: 0.10.0
libtpu: 0.0.40
codegen_flags: <defaults>
</compile_context>

<pallas_src>
import math
import jax
import jax.numpy as jnp
from jax.experimental import pallas as pl
from jax.experimental.pallas import tpu as pltpu

_VMEM_LIMIT = 40 * 1024 * 1024  # below v7x's 64 MiB physical; plenty on v5e/v6e


def _round_up(n, m):
    return ((n + m - 1) // m) * m


# ---------------------------------------------------------------------------
# Row-tiled projection / FC kernels (big MXU matmuls, "parallel" grid).
# Matmul inputs are bf16, accumulation f32 (preferred_element_type).
# ---------------------------------------------------------------------------
def _proj1_kernel(x_ref, wf_ref, wr_ref, bf_ref, br_ref, gxf_ref, gxr_ref):
    x = x_ref[...]
    gxf = jnp.dot(x, wf_ref[...], preferred_element_type=jnp.float32) + bf_ref[...]
    gxr = jnp.dot(x, wr_ref[...], preferred_element_type=jnp.float32) + br_ref[...]
    gxf_ref[...] = gxf.astype(gxf_ref.dtype)
    gxr_ref[...] = gxr.astype(gxr_ref.dtype)


def _proj2_kernel(ya_ref, yb_ref, wfa_ref, wfb_ref, wra_ref, wrb_ref,
                  bf_ref, br_ref, gxf_ref, gxr_ref):
    # Two summed matmuls per direction instead of concatenating [y_fwd|y_rev].
    ya = ya_ref[...]
    yb = yb_ref[...]
    gxf = (jnp.dot(ya, wfa_ref[...], preferred_element_type=jnp.float32)
           + jnp.dot(yb, wfb_ref[...], preferred_element_type=jnp.float32)
           + bf_ref[...])
    gxr = (jnp.dot(ya, wra_ref[...], preferred_element_type=jnp.float32)
           + jnp.dot(yb, wrb_ref[...], preferred_element_type=jnp.float32)
           + br_ref[...])
    gxf_ref[...] = gxf.astype(gxf_ref.dtype)
    gxr_ref[...] = gxr.astype(gxr_ref.dtype)


def _make_fc_logsoftmax_kernel(out_size):
    def kernel(ya_ref, yb_ref, wa_ref, wb_ref, b_ref, o_ref):
        # Lane-dense (padded-to-128) logits; pad columns carry bias -1e30 so
        # they contribute exp(.) == 0 to the partition function.
        logits = (
            jnp.dot(ya_ref[...], wa_ref[...], preferred_element_type=jnp.float32)
            + jnp.dot(yb_ref[...], wb_ref[...], preferred_element_type=jnp.float32)
            + b_ref[...])
        m = jnp.max(logits, axis=-1, keepdims=True)
        z = logits - m
        lse = jnp.log(jnp.sum(jnp.exp(z), axis=-1, keepdims=True))
        o_ref[...] = (z - lse)[:, :out_size]   # only the real classes hit HBM
    return kernel


def _row_tiled_call(kernel, row_inputs, shared_inputs, n_rows, out_cols,
                    out_dtypes, block_rows=None):
    """Run `kernel` over row-blocks of the (N, K) row_inputs; 2-D shared inputs
    (weights / bias) are replicated to every grid step.  No host-side padding:
    grid = cdiv(N, rb); ragged trailing blocks rely on Pallas masked writeback
    (rows are independent)."""
    if block_rows is None:
        k_total = sum(int(a.shape[1]) for a in row_inputs)
        o_total = sum(int(c) for c in out_cols)
        per_row = 2 * 2 * (k_total + o_total) + 8   # double-buffered ~bf16 in/out
        block_rows = max(8, min(1024, (16 * 1024 * 1024) // max(per_row, 1)))
        block_rows = max(8, (block_rows // 8) * 8)
    rb = min(block_rows, _round_up(n_rows, 8))
    grid = pl.cdiv(n_rows, rb)

    in_specs = [pl.BlockSpec((rb, int(a.shape[1])), lambda i: (i, 0))
                for a in row_inputs]
    in_specs += [pl.BlockSpec(s.shape, lambda i: (0, 0)) for s in shared_inputs]
    out_shape = tuple(jax.ShapeDtypeStruct((n_rows, int(oc)), dt)
                      for oc, dt in zip(out_cols, out_dtypes))
    out_specs = tuple(pl.BlockSpec((rb, int(oc)), lambda i: (i, 0))
                      for oc in out_cols)

    outs = pl.pallas_call(
        kernel,
        out_shape=out_shape,
        grid=(grid,),
        in_specs=in_specs,
        out_specs=out_specs,
        compiler_params=pltpu.CompilerParams(
            dimension_semantics=("parallel",),
            vmem_limit_bytes=_VMEM_LIMIT),
    )(*row_inputs, *shared_inputs)
    return outs


# ---------------------------------------------------------------------------
# Fused bidirectional LSTM recurrence, time-chunked over a sequential grid.
#   gxf / gxr : (T, B, 4H) bf16 precomputed per-direction x@Wih + b
#   w_hf/w_hr : (H, 4H) bf16 recurrent weights (per direction)
#   outputs   : y_fwd, y_rev  (T, B, H) bf16 (PyTorch's two output halves)
#   scratch   : h (2,B,H) bf16 and c (2,B,H) f32 carried across chunks.
# Gate order within each 4H block matches PyTorch: [i, f, g, o].
# ---------------------------------------------------------------------------
def _bilstm_recurrence(gxf, gxr, w_hf, w_hr, hidden_size, time_chunk=None):
    T, B, G = gxf.shape
    H = hidden_size
    if time_chunk is None:
        # double-buffered bf16 gx+y blocks, both directions, ~12 MiB budget
        per_t = 2 * 2 * B * (4 * H + H) * 2
        time_chunk = max(8, min(512, (12 * 1024 * 1024) // max(per_t, 1)))
    Tc = min(time_chunk, T)
    nc = pl.cdiv(T, Tc)
    need_mask = (T % Tc) != 0

    def kernel(gxf_ref, gxr_ref, whf_ref, whr_ref, yf_ref, yr_ref, h_ref, c_ref):
        i_chunk = pl.program_id(0)

        @pl.when(i_chunk == 0)
        def _():
            h_ref[...] = jnp.zeros_like(h_ref)
            c_ref[...] = jnp.zeros_like(c_ref)

        def sigm(x):
            # sigmoid(x) == 0.5*tanh(0.5x)+0.5 : one EUP push instead of exp+recip.
            return 0.5 * jnp.tanh(0.5 * x) + 0.5

        def cell(gates, c_prev):
            # NOTE: slices are lane-aligned automatically when H % 128 == 0.
            i_g = sigm(gates[:, 0 * H:1 * H])
            f_g = sigm(gates[:, 1 * H:2 * H])
            g_g = jnp.tanh(gates[:, 2 * H:3 * H])
            o_g = sigm(gates[:, 3 * H:4 * H])
            c_new = f_g * c_prev + i_g * g_g
            h_new = o_g * jnp.tanh(c_new)
            return h_new, c_new

        def step(s, carry):
            hf, hr, cf, cr = carry                    # vreg-carried state
            sr = Tc - 1 - s
            ghf = jnp.dot(hf, whf_ref[...], preferred_element_type=jnp.float32)
            ghr = jnp.dot(hr, whr_ref[...], preferred_element_type=jnp.float32)
            gates_f = gxf_ref[s].astype(jnp.float32) + ghf
            gates_r = gxr_ref[sr].astype(jnp.float32) + ghr
            hf_n, cf_n = cell(gates_f, cf)
            hr_n, cr_n = cell(gates_r, cr)
            hf_b = hf_n.astype(jnp.bfloat16)
            hr_b = hr_n.astype(jnp.bfloat16)
            yf_ref[s] = hf_b                          # OOB tail masked at writeback
            yr_ref[sr] = hr_b
            if need_mask:
                # Ragged final time chunk: keep state frozen on pad steps.  The
                # reverse stream consumes the pad steps *first*, so this guard
                # is what keeps its initial state exactly zero.
                fwd_ok = (i_chunk * Tc + s) < T
                rev_ok = ((nc - 1 - i_chunk) * Tc + sr) < T
                hf_b = jnp.where(fwd_ok, hf_b, hf)
                cf_n = jnp.where(fwd_ok, cf_n, cf)
                hr_b = jnp.where(rev_ok, hr_b, hr)
                cr_n = jnp.where(rev_ok, cr_n, cr)
            return hf_b, hr_b, cf_n, cr_n

        init = (h_ref[0], h_ref[1], c_ref[0], c_ref[1])
        hf, hr, cf, cr = jax.lax.fori_loop(0, Tc, step, init, unroll=2)
        h_ref[0] = hf
        h_ref[1] = hr
        c_ref[0] = cf
        c_ref[1] = cr

    yf, yr = pl.pallas_call(
        kernel,
        out_shape=(jax.ShapeDtypeStruct((T, B, H), jnp.bfloat16),
                   jax.ShapeDtypeStruct((T, B, H), jnp.bfloat16)),
        grid=(nc,),
        in_specs=[
            pl.BlockSpec((Tc, B, G), lambda i: (i, 0, 0)),
            pl.BlockSpec((Tc, B, G), lambda i: (nc - 1 - i, 0, 0)),
            pl.BlockSpec((H, G), lambda i: (0, 0)),
            pl.BlockSpec((H, G), lambda i: (0, 0)),
        ],
        out_specs=(
            pl.BlockSpec((Tc, B, H), lambda i: (i, 0, 0)),
            pl.BlockSpec((Tc, B, H), lambda i: (nc - 1 - i, 0, 0)),
        ),
        scratch_shapes=[
            pltpu.VMEM((2, B, H), jnp.bfloat16),   # h_fwd / h_rev
            pltpu.VMEM((2, B, H), jnp.float32),    # c_fwd / c_rev (exact)
        ],
        compiler_params=pltpu.CompilerParams(
            dimension_semantics=("arbitrary",),
            vmem_limit_bytes=_VMEM_LIMIT),
    )(gxf, gxr, w_hf, w_hr)
    return yf, yr


# ---------------------------------------------------------------------------
# One-time parameter preprocessing (transpose / split per direction / bias
# combine / bf16 cast / FC lane padding).
# ---------------------------------------------------------------------------
def prepare_params(raw_layers, fc_w, fc_b, hidden_size, output_size):
    H = hidden_size
    layers = []
    for li, layer in enumerate(raw_layers):
        w_ih_f, w_hh_f, b_ih_f, b_hh_f = layer["fwd"]
        w_ih_r, w_hh_r, b_ih_r, b_hh_r = layer["rev"]
        entry = {
            "b_f": (b_ih_f + b_hh_f).reshape(1, 4 * H).astype(jnp.float32),
            "b_r": (b_ih_r + b_hh_r).reshape(1, 4 * H).astype(jnp.float32),
            "w_hf": w_hh_f.T.astype(jnp.bfloat16),       # (H, 4H)
            "w_hr": w_hh_r.T.astype(jnp.bfloat16),
        }
        if li == 0:
            entry["w_xf"] = w_ih_f.T.astype(jnp.bfloat16)   # (F, 4H)
            entry["w_xr"] = w_ih_r.T.astype(jnp.bfloat16)
        else:
            wf = w_ih_f.T.astype(jnp.bfloat16)              # (2H, 4H)
            wr = w_ih_r.T.astype(jnp.bfloat16)
            entry["w_xfa"] = wf[:H]     # multiplies previous layer's fwd stream
            entry["w_xfb"] = wf[H:]     # multiplies previous layer's rev stream
            entry["w_xra"] = wr[:H]
            entry["w_xrb"] = wr[H:]
        layers.append(entry)

    O = output_size
    o_pad = _round_up(O, 128)           # lane-dense logits inside the FC kernel
    w_fc = jnp.zeros((2 * H, o_pad), jnp.float32).at[:, :O].set(fc_w.T)
    b_fc = jnp.full((1, o_pad), -1e30, jnp.float32).at[0, :O].set(fc_b)
    return {
        "layers": layers,
        "fc_wa": w_fc[:H].astype(jnp.bfloat16),
        "fc_wb": w_fc[H:].astype(jnp.bfloat16),
        "fc_b": b_fc,
        "hidden_size": H,
        "output_size": O,
    }


# ---------------------------------------------------------------------------
# Full forward pass.
# ---------------------------------------------------------------------------
def forced_alignment_ctc_lstm_forward(x, params):
    """x: (B, T, input_size) batch-first float32. Returns (B, T, output_size)."""
    B, T, F = x.shape
    H = params["hidden_size"]
    O = params["output_size"]

    Bp = _round_up(B, 8)                 # sublane-dense batch for the recurrence
    if Bp != B:
        x = jnp.pad(x, ((0, Bp - B), (0, 0), (0, 0)))
    N = T * Bp
    x_tm = jnp.transpose(x, (1, 0, 2)).reshape(N, F).astype(jnp.bfloat16)

    ya = yb = None
    for li, layer in enumerate(params["layers"]):
        if li == 0:
            gxf, gxr = _row_tiled_call(
                _proj1_kernel, [x_tm],
                [layer["w_xf"], layer["w_xr"], layer["b_f"], layer["b_r"]],
                N, out_cols=(4 * H, 4 * H),
                out_dtypes=(jnp.bfloat16, jnp.bfloat16))
        else:
            gxf, gxr = _row_tiled_call(
                _proj2_kernel,
                [ya.reshape(N, H), yb.reshape(N, H)],
                [layer["w_xfa"], layer["w_xfb"], layer["w_xra"], layer["w_xrb"],
                 layer["b_f"], layer["b_r"]],
                N, out_cols=(4 * H, 4 * H),
                out_dtypes=(jnp.bfloat16, jnp.bfloat16))
        ya, yb = _bilstm_recurrence(gxf.reshape(T, Bp, 4 * H),
                                    gxr.reshape(T, Bp, 4 * H),
                                    layer["w_hf"], layer["w_hr"], H)

    (out,) = _row_tiled_call(
        _make_fc_logsoftmax_kernel(O),
        [ya.reshape(N, H), yb.reshape(N, H)],
        [params["fc_wa"], params["fc_wb"], params["fc_b"]],
        N, out_cols=(O,), out_dtypes=(jnp.float32,))
    out = out.reshape(T, Bp, O)
    return jnp.transpose(out, (1, 0, 2))[:B]          # (B, T, O)


# ---------------------------------------------------------------------------
# Deterministic parameter init (PyTorch LSTM/Linear shapes) + pure-JAX reference.
# ---------------------------------------------------------------------------
def init_params(key, input_size, hidden_size, output_size, num_layers=3):
    k = 1.0 / math.sqrt(hidden_size)
    layers = []
    for l in range(num_layers):
        din = input_size if l == 0 else 2 * hidden_size
        layer = {}
        for name in ("fwd", "rev"):
            key, k1, k2, k3, k4 = jax.random.split(key, 5)
            w_ih = jax.random.uniform(k1, (4 * hidden_size, din), jnp.float32, -k, k)
            w_hh = jax.random.uniform(k2, (4 * hidden_size, hidden_size), jnp.float32, -k, k)
            b_ih = jax.random.uniform(k3, (4 * hidden_size,), jnp.float32, -k, k)
            b_hh = jax.random.uniform(k4, (4 * hidden_size,), jnp.float32, -k, k)
            layer[name] = (w_ih, w_hh, b_ih, b_hh)
        layers.append(layer)
    kfc = 1.0 / math.sqrt(2 * hidden_size)
    key, kf1, kf2 = jax.random.split(key, 3)
    fc_w = jax.random.uniform(kf1, (output_size, 2 * hidden_size), jnp.float32, -kfc, kfc)
    fc_b = jax.random.uniform(kf2, (output_size,), jnp.float32, -kfc, kfc)
    return layers, fc_w, fc_b


def reference_forward(x, raw_layers, fc_w, fc_b, hidden_size):
    """Pure-JAX f32 reference of the PyTorch forward (inference, no dropout)."""
    B, T, F = x.shape
    H = hidden_size

    def run_dir(inp, wih, whh, bih, bhh, reverse):
        seq = inp[:, ::-1, :] if reverse else inp

        def cell(carry, xt):
            h, c = carry
            g = xt @ wih.T + bih + h @ whh.T + bhh
            i = jax.nn.sigmoid(g[:, :H])
            f = jax.nn.sigmoid(g[:, H:2 * H])
            gg = jnp.tanh(g[:, 2 * H:3 * H])
            o = jax.nn.sigmoid(g[:, 3 * H:4 * H])
            c = f * c + i * gg
            h = o * jnp.tanh(c)
            return (h, c), h

        init = (jnp.zeros((B, H), jnp.float32), jnp.zeros((B, H), jnp.float32))
        _, ys = jax.lax.scan(cell, init, jnp.swapaxes(seq, 0, 1))
        ys = jnp.swapaxes(ys, 0, 1)
        return ys[:, ::-1, :] if reverse else ys

    h = x
    for layer in raw_layers:
        yf = run_dir(h, *layer["fwd"], reverse=False)
        yr = run_dir(h, *layer["rev"], reverse=True)
        h = jnp.concatenate([yf, yr], axis=-1)
    logits = h @ fc_w.T + fc_b
    return jax.nn.log_softmax(logits, axis=-1)


if __name__ == "__main__":
    B, T = 2, 8
    input_size, hidden_size, output_size = 16, 32, 10

    key = jax.random.PRNGKey(0)
    key, kx = jax.random.split(key)
    x = jax.random.normal(kx, (B, T, input_size), jnp.float32)

    raw_layers, fc_w, fc_b = init_params(key, input_size, hidden_size, output_size)
    params = prepare_params(raw_layers, fc_w, fc_b, hidden_size, output_size)

    out = forced_alignment_ctc_lstm_forward(x, params)
    out = jax.block_until_ready(out)

    assert out.shape == (B, T, output_size)
    assert bool(jnp.all(jnp.isfinite(out)))
    # log_softmax sanity: probabilities sum to 1 per frame.
    assert bool(jnp.allclose(jnp.sum(jnp.exp(out), axis=-1), 1.0, atol=1e-4))
    # Numerical agreement with a pure-JAX f32 reference (bf16 MXU path => loose tol).
    ref = reference_forward(x, raw_layers, fc_w, fc_b, hidden_size)
    assert bool(jnp.max(jnp.abs(out - ref)) < 0.1)
    print("KERNEL_OK")
</pallas_src>

<mosaic_0001>
module attributes {stable_mosaic.version = 11 : i64} {
  func.func @_proj1_kernel(%arg0: i32, %arg1: memref<64x16xbf16, #tpu.memory_space<vmem>>, %arg2: memref<16x128xbf16, #tpu.memory_space<vmem>>, %arg3: memref<16x128xbf16, #tpu.memory_space<vmem>>, %arg4: memref<1x128xf32, #tpu.memory_space<vmem>>, %arg5: memref<1x128xf32, #tpu.memory_space<vmem>>, %arg6: memref<64x128xbf16, #tpu.memory_space<vmem>>, %arg7: memref<64x128xbf16, #tpu.memory_space<vmem>>) attributes {dimension_semantics = [#tpu.dimension_semantics<parallel>], iteration_bounds = array<i64: 1>, scalar_prefetch = 0 : i64, scratch_operands = 0 : i64, tpu.core_type = #tpu.core_type<tc>, window_params = [{transform_indices = @transform_0, window_bounds = array<i64: 64, 16>}, {pipeline_mode = #tpu.pipeline_mode<synchronous>, transform_indices = @transform_1, window_bounds = array<i64: 16, 128>}, {pipeline_mode = #tpu.pipeline_mode<synchronous>, transform_indices = @transform_2, window_bounds = array<i64: 16, 128>}, {pipeline_mode = #tpu.pipeline_mode<synchronous>, transform_indices = @transform_3, window_bounds = array<i64: 1, 128>}, {pipeline_mode = #tpu.pipeline_mode<synchronous>, transform_indices = @transform_4, window_bounds = array<i64: 1, 128>}, {transform_indices = @transform_5, window_bounds = array<i64: 64, 128>}, {transform_indices = @transform_6, window_bounds = array<i64: 64, 128>}]} {
    %c0 = arith.constant 0 : index
    %c0_0 = arith.constant 0 : index
    %0 = vector.load %arg1[%c0, %c0_0] : memref<64x16xbf16, #tpu.memory_space<vmem>>, vector<64x16xbf16>
    %c0_1 = arith.constant 0 : index
    %c0_2 = arith.constant 0 : index
    %1 = vector.load %arg2[%c0_1, %c0_2] : memref<16x128xbf16, #tpu.memory_space<vmem>>, vector<16x128xbf16>
    %cst = arith.constant dense<0.000000e+00> : vector<64x128xf32>
    %2 = tpu.matmul %0, %1, %cst {dimension_numbers = #tpu.dot_dimension_numbers<[1], [0], [0], [1], [0, 0, 1, 1], [], []>} : vector<64x16xbf16>, vector<16x128xbf16>, vector<64x128xf32> -> vector<64x128xf32>
    %c0_3 = arith.constant 0 : index
    %c0_4 = arith.constant 0 : index
    %3 = vector.load %arg4[%c0_3, %c0_4] : memref<1x128xf32, #tpu.memory_space<vmem>>, vector<1x128xf32>
    %4 = vector.broadcast %3 : vector<1x128xf32> to vector<64x128xf32>
    %5 = arith.addf %2, %4 : vector<64x128xf32>
    %c0_5 = arith.constant 0 : index
    %c0_6 = arith.constant 0 : index
    %6 = vector.load %arg3[%c0_5, %c0_6] : memref<16x128xbf16, #tpu.memory_space<vmem>>, vector<16x128xbf16>
    %cst_7 = arith.constant dense<0.000000e+00> : vector<64x128xf32>
    %7 = tpu.matmul %0, %6, %cst_7 {dimension_numbers = #tpu.dot_dimension_numbers<[1], [0], [0], [1], [0, 0, 1, 1], [], []>} : vector<64x16xbf16>, vector<16x128xbf16>, vector<64x128xf32> -> vector<64x128xf32>
    %c0_8 = arith.constant 0 : index
    %c0_9 = arith.constant 0 : index
    %8 = vector.load %arg5[%c0_8, %c0_9] : memref<1x128xf32, #tpu.memory_space<vmem>>, vector<1x128xf32>
    %9 = vector.broadcast %8 : vector<1x128xf32> to vector<64x128xf32>
    %10 = arith.addf %7, %9 : vector<64x128xf32>
    %11 = arith.truncf %5 : vector<64x128xf32> to vector<64x128xbf16>
    %c0_10 = arith.constant 0 : index
    %c0_11 = arith.constant 0 : index
    %12 = vector.load %arg6[%c0_10, %c0_11] : memref<64x128xbf16, #tpu.memory_space<vmem>>, vector<64x128xbf16>
    tpu.vector_store %arg6[%c0_10, %c0_11], %11 {strides = array<i32>} : memref<64x128xbf16, #tpu.memory_space<vmem>>, vector<64x128xbf16>,
    %13 = arith.truncf %10 : vector<64x128xf32> to vector<64x128xbf16>
    %c0_12 = arith.constant 0 : index
    %c0_13 = arith.constant 0 : index
    %14 = vector.load %arg7[%c0_12, %c0_13] : memref<64x128xbf16, #tpu.memory_space<vmem>>, vector<64x128xbf16>
    tpu.vector_store %arg7[%c0_12, %c0_13], %13 {strides = array<i32>} : memref<64x128xbf16, #tpu.memory_space<vmem>>, vector<64x128xbf16>,
    return
  }
  func.func @transform_0(%arg0: i32) -> (i32, i32) {
    %c0_i32 = arith.constant 0 : i32
    %c0_i32_0 = arith.constant 0 : i32
    return %arg0, %c0_i32 : i32, i32
  }
  func.func @transform_1(%arg0: i32) -> (i32, i32) {
    %c0_i32 = arith.constant 0 : i32
    %c0_i32_0 = arith.constant 0 : i32
    %c0_i32_1 = arith.constant 0 : i32
    return %c0_i32, %c0_i32_0 : i32, i32
  }
  func.func @transform_2(%arg0: i32) -> (i32, i32) {
    %c0_i32 = arith.constant 0 : i32
    %c0_i32_0 = arith.constant 0 : i32
    %c0_i32_1 = arith.constant 0 : i32
    return %c0_i32, %c0_i32_0 : i32, i32
  }
  func.func @transform_3(%arg0: i32) -> (i32, i32) {
    %c0_i32 = arith.constant 0 : i32
    %c0_i32_0 = arith.constant 0 : i32
    %c0_i32_1 = arith.constant 0 : i32
    return %c0_i32, %c0_i32_0 : i32, i32
  }
  func.func @transform_4(%arg0: i32) -> (i32, i32) {
    %c0_i32 = arith.constant 0 : i32
    %c0_i32_0 = arith.constant 0 : i32
    %c0_i32_1 = arith.constant 0 : i32
    return %c0_i32, %c0_i32_0 : i32, i32
  }
  func.func @transform_5(%arg0: i32) -> (i32, i32) {
    %c0_i32 = arith.constant 0 : i32
    %c0_i32_0 = arith.constant 0 : i32
    return %arg0, %c0_i32 : i32, i32
  }
  func.func @transform_6(%arg0: i32) -> (i32, i32) {
    %c0_i32 = arith.constant 0 : i32
    %c0_i32_0 = arith.constant 0 : i32
    return %arg0, %c0_i32 : i32, i32
  }
}

</mosaic_0001>

<bundles_post_ra>
// kernel: tpu_custom_call.1
= control target key start
LH: loop header
LB: loop body
LE: loop exit
PB: predicated region body
PF: predicated region fallthrough
CT: control target
= control target key end

     0   :  { %12 = vsyncpa [#allocation3], 0  ;;  %vm68_vm0 = vcmask 130048   ;;  %s593_s0 = inlined_call_operand.vmem [shape: bf16[64,16], index: 0, kind: input, shape index: {}]   ;;  %s594_s1 = inlined_call_operand.vmem [shape: bf16[16,128], index: 1, kind: input, shape index: {}]   ;;  %s595_s2 = inlined_call_operand.vmem [shape: bf16[16,128], index: 2, kind: input, shape index: {}]   ;;  %s596_s3 = inlined_call_operand.vmem [shape: f32[1,128], index: 3, kind: input, shape index: {}]   ;;  %s597_s4 = inlined_call_operand.vmem [shape: f32[1,128], index: 4, kind: input, shape index: {}]   ;;  %s598_s5 = inlined_call_operand.hbm [shape: bf16[64,128], index: 5, kind: output, shape index: {0}]   ;;  %s599_s6 = inlined_call_operand.hbm [shape: bf16[64,128], index: 6, kind: output, shape index: {1}]  }
   0x1   :  { %v466_v0 = vld [vmem:[%s594_s1] sm:$0xff]   ;;  %v469_v3 = vld [vmem:[%s593_s0 + $0x8] sm:$0xff]   ;;  %v470_v4 = vld [vmem:[%s593_s0 + $0x10] sm:$0xff]  }
   0x2   :  { %v467_v1 = vld [vmem:[%s595_s2] sm:$0xff]   ;;  %442 = vmatprep.subr.bf16.mxu0 %v466_v0 }
   0x3   :  { %v468_v2 = vld [vmem:[%s593_s0] sm:$0xff]   ;;  %452 = vmatprep.subr.bf16.mxu1 %v467_v1  ;;  %443 = vmatpush3.bf16.msra.mxu0 %v466_v0 }
   0x4   :  { %453 = vmatpush3.bf16.msra.mxu1 %v467_v1  ;;  %444 = vmatprep.mubr.msk.bf16.mxu0 %vm68_vm0, %v468_v2 }
   0x5   :  { %454 = vmatprep.mubr.msk.bf16.mxu1 %vm68_vm0, %v468_v2 }
   0x6   :  { %445 = vmatmul.mubr.msk.bf16.vlgmr.msra.gmra.mxu0 %vm68_vm0, %v469_v3 }
   0x7   :  { %13 = vsyncpa [#allocation5], 0  ;;  %455 = vmatmul.mubr.msk.bf16.vlgmr.msra.gmra.mxu1 %vm68_vm0, %v469_v3  ;;  %448 = vmatprep.mubr.msk.bf16.mxu0 %vm68_vm0, %v470_v4  ;;  %v471_v5 = vld [vmem:[%s593_s0 + $0x18] sm:$0xff]   ;;  %v338_v8 = vld [vmem:[%s596_s3] ss:$0 sm:$0xff]  ;;  %s516_s0 = smov [#allocation2]  }
   0x8   :  { %458 = vmatprep.mubr.msk.bf16.mxu1 %vm68_vm0, %v470_v4  ;;  %v348_v10 = vld [vmem:[%s597_s4] ss:$0 sm:$0xff]  ;;  %s311_s3 = sshll.u32 %s516_s0, 4  ;;  %s517_s4 = smov [#allocation4]   ;;  %s312_s3 = int_to_ptr.vmem [resolvable:$true] %s311_s3 }
   0x9   :  { %s323_s11 = sshll.u32 %s517_s4, 4  ;;  %s472_s12 = scalar_lea.vmem %s312_s3, 512  ;;  %s324_s11 = int_to_ptr.vmem [resolvable:$true] %s323_s11 }
   0xa   :  { %p473_p0 = scmp.ne.s32.totalorder %s312_s3, %s472_s12  ;;  %p477_p1 = scmp.lt.s32.totalorder %s312_s3, %s312_s3 }
   0xb   :  { %p478_p2 = scmp.lt.s32.totalorder %s472_s12, %s472_s12 }
   0xd   :  { %p479_p3 = por %p478_p2, %p477_p1 }
   0xe   :  { %449 = vmatmul.mubr.msk.bf16.gmra.mxu0 %vm68_vm0, %v471_v5 }
   0xf   :  { %459 = vmatmul.mubr.msk.bf16.gmra.mxu1 %vm68_vm0, %v471_v5  ;;  %p480_p4 = pnand %p479_p3, %p473_p0 }
  0xc6   :  { %v446_v6 = vpop.f32.mrf.mxu0 }
  0xc7   :  { %v456_v7 = vpop.f32.mrf.mxu1  ;;  %v124_v13 = vadd.f32 %v446_v6, %v338_v8 }
  0xc8   :  { %v115_v9 = vpop.f32.mrf.mxu0  ;;  %v204_v16 = vadd.f32 %v456_v7, %v348_v10 }
  0xc9   :  { %v195_v11 = vpop.f32.mrf.mxu1  ;;  %v116_v19 = vadd.f32 %v338_v8, %v115_v9 }
  0xca   :  { %v447_v12 = vpop.f32.mrf.mxu0  ;;  %v196_v23 = vadd.f32 %v348_v10, %v195_v11 }
  0xcb   :  { %v127_v14 = vadd.f32 %v447_v12, %v338_v8  ;;  %v457_v15 = vpop.f32.mrf.mxu1 }
  0xcc   :  { %v207_v17 = vadd.f32 %v457_v15, %v348_v10  ;;  %v118_v18 = vpop.f32.mrf.mxu0 }
  0xcd   :  { %v394_v20 = vpack.c.bf16 %v127_v14, %v124_v13  ;;  %v119_v21 = vadd.f32 %v338_v8, %v118_v18  ;;  %v198_v22 = vpop.f32.mrf.mxu1 }
  0xce   :  { %v414_v24 = vpack.c.bf16 %v207_v17, %v204_v16  ;;  %v199_v25 = vadd.f32 %v348_v10, %v198_v22  ;;  %v450_v26 = vpop.f32.mrf.mxu0 }
  0xcf   :  { %426 = vst [vmem:[#allocation2 + $0x8] sm:$0xff] %v394_v20   ;;  %v389_v27 = vpack.c.bf16 %v119_v21, %v116_v19  ;;  %v460_v28 = vpop.f32.mrf.mxu1  ;;  %v140_v33 = vadd.f32 %v450_v26, %v338_v8 }
  0xd0   :  { %429 = vst [vmem:[#allocation4 + $0x8] sm:$0xff] %v414_v24   ;;  %v409_v29 = vpack.c.bf16 %v199_v25, %v196_v23  ;;  %v131_v30 = vpop.f32.mrf.mxu0  ;;  %v220_v36 = vadd.f32 %v460_v28, %v348_v10 }
  0xd1   :  { %390 = vst [vmem:[#allocation2] sm:$0xff] %v389_v27   ;;  %v211_v31 = vpop.f32.mrf.mxu1  ;;  %v132_v39 = vadd.f32 %v338_v8, %v131_v30 }
  0xd2   :  { %410 = vst [vmem:[#allocation4] sm:$0xff] %v409_v29   ;;  %v451_v32 = vpop.f32.mrf.mxu0  ;;  %v212_v43 = vadd.f32 %v348_v10, %v211_v31 }
  0xd3   :  { %v143_v34 = vadd.f32 %v451_v32, %v338_v8  ;;  %v461_v35 = vpop.f32.mrf.mxu1 }
  0xd4   :  { %v223_v37 = vadd.f32 %v461_v35, %v348_v10  ;;  %v134_v38 = vpop.f32.mrf.mxu0 }
  0xd5   :  { %v404_v40 = vpack.c.bf16 %v143_v34, %v140_v33  ;;  %v135_v41 = vadd.f32 %v338_v8, %v134_v38  ;;  %v214_v42 = vpop.f32.mrf.mxu1 }
  0xd6   :  { %v424_v44 = vpack.c.bf16 %v223_v37, %v220_v36  ;;  %v215_v45 = vadd.f32 %v348_v10, %v214_v42 }
  0xd7   :  { %428 = vst [vmem:[#allocation2 + $0x18] sm:$0xff] %v404_v40   ;;  %v399_v46 = vpack.c.bf16 %v135_v41, %v132_v39 }
  0xd8   :  { %431 = vst [vmem:[#allocation4 + $0x18] sm:$0xff] %v424_v44   ;;  %v419_v47 = vpack.c.bf16 %v215_v45, %v212_v43 }
  0xd9   :  { %427 = vst [vmem:[#allocation2 + $0x10] sm:$0xff] %v399_v46  }
  0xda   :  { %430 = vst [vmem:[#allocation4 + $0x10] sm:$0xff] %v419_v47  }
  0xdb   :  { %483 = shalt.err (!%p480_p4)
}
  0xdc   :  { %s518_s13 = smov 64   ;;  %s519_s14 = smov 4  }
  0xdd   :  { %317 = dma.vmem_to_hbm [thread:$0]  %s312_s3, 512, %s598_s5, [#allocation3], %s518_s13, %s518_s13, %s519_s14  }
  0xde   :  { %s492_s17 = scalar_lea.vmem %s324_s11, 512  ;;  %p497_p6 = scmp.lt.s32.totalorder %s324_s11, %s324_s11 }
  0xdf   :  { %p493_p5 = scmp.ne.s32.totalorder %s324_s11, %s492_s17  ;;  %p498_p7 = scmp.lt.s32.totalorder %s492_s17, %s492_s17 }
  0xe1   :  { %p499_p8 = por %p498_p7, %p497_p6 }
  0xe3   :  { %p500_p9 = pnand %p499_p8, %p493_p5 }
  0xe5   :  { %503 = shalt.err (!%p500_p9)
}
  0xe6   :  { %329 = dma.vmem_to_hbm [thread:$0]  %s324_s11, 512, %s599_s6, [#allocation5], %s518_s13, %s518_s13, %s519_s14  }
  0xe7   :  { %512 = dma.done.wait [#allocation3], 512  }
  0xe8   :  { %513 = vsyncadd [#allocation3], 4294966784 }
  0xe9   :  { %514 = dma.done.wait [#allocation5], 512  }
  0xea   :  { %515 = vsyncadd [#allocation5], 4294966784 }
  0xeb   :  { %336 = vsyncpa [#allocation3], 1 }
  0xec   :  { %337 = vsyncpa [#allocation5], 1 }

</bundles_post_ra>
